<compile_context>
chip_gen: v5e
topology: v5e:2x2
jax: 0.10.0
libtpu: 0.0.40
codegen_flags: <defaults>
</compile_context>

<pallas_src>
import jax
import jax.numpy as jnp
from jax.experimental import pallas as pl
from jax.experimental.pallas import tpu as pltpu


NEG_SLOPE = 0.01  # F.leaky_relu default negative_slope


def _leaky_relu(v):
    return jnp.where(v >= 0, v, NEG_SLOPE * v)


def _round_up(n, m):
    return ((n + m - 1) // m) * m


def ann_tlc_kernel(x_ref, w_in_ref, b_in_ref, w_h_ref, b_h_ref,
                   w_out_ref, b_out_ref, o_ref):
    # x_ref: (bt, in_n). Flip to (in_n, bt) in-kernel (XLU; ~free under the
    # MXU-bound compute) and cast matmul operands to bf16 (f32 accumulation).
    x = x_ref[...].T.astype(jnp.bfloat16)                       # (in_n, bt)

    # input layer: (hid, in_n) @ (in_n, bt) -> (hid, bt), f32 accumulate.
    w_in = w_in_ref[...].astype(jnp.bfloat16)
    h = jnp.dot(w_in, x, preferred_element_type=jnp.float32)
    h = _leaky_relu(h + b_in_ref[...])                          # (hid,1) lane-bcast

    # shared hidden layer applied 3x; weight cast hoisted, bias stays (hid, 1).
    w_h = w_h_ref[...].astype(jnp.bfloat16)
    b_h = b_h_ref[...]
    for _ in range(3):
        h = jnp.dot(w_h, h.astype(jnp.bfloat16),
                    preferred_element_type=jnp.float32)
        h = _leaky_relu(h + b_h)

    # output layer + sigmoid; transpose the small (out_n, bt) result so the
    # store is (bt, out_n) and the wrapper needs no .T / slice afterwards.
    w_out = w_out_ref[...].astype(jnp.bfloat16)
    y = jnp.dot(w_out, h.astype(jnp.bfloat16),
                preferred_element_type=jnp.float32) + b_out_ref[...]
    o_ref[...] = jax.nn.sigmoid(y).T.astype(o_ref.dtype)


def ann_tlc_forward(x, params, *, batch_tile=8192):
    """Fused ANN_TLC forward pass.

    x:      (B, in_neuron) float32
    params: PyTorch-native shapes:
            w_in (hid, in), b_in (hid, 1), w_h (hid, hid), b_h (hid, 1),
            w_out (out, hid), b_out (out, 1)
    returns (B, out_neuron) float32
    """
    B, in_n = x.shape
    hid = params["w_h"].shape[0]
    out_n = params["w_out"].shape[0]

    # Batch tile (lane axis in-kernel): multiple of 128, no bigger than needed.
    bt = min(_round_up(batch_tile, 128), _round_up(B, 128))
    # v7x megacore: keep >=2 grid steps when the batch is big enough to split.
    if B > 256 and pl.cdiv(B, bt) < 2:
        bt = _round_up(pl.cdiv(B, 2), 128)
    grid = (pl.cdiv(B, bt),)

    # Batch-tiled input/output (partial last block handled by Pallas masking);
    # parameters use a constant index_map -> fetched once, no per-step re-DMA.
    x_spec = pl.BlockSpec((bt, in_n), lambda i: (i, 0))
    o_spec = pl.BlockSpec((bt, out_n), lambda i: (i, 0))
    w_in_spec = pl.BlockSpec((hid, in_n), lambda i: (0, 0))
    b_in_spec = pl.BlockSpec((hid, 1), lambda i: (0, 0))
    w_h_spec = pl.BlockSpec((hid, hid), lambda i: (0, 0))
    b_h_spec = pl.BlockSpec((hid, 1), lambda i: (0, 0))
    w_out_spec = pl.BlockSpec((out_n, hid), lambda i: (0, 0))
    b_out_spec = pl.BlockSpec((out_n, 1), lambda i: (0, 0))

    weight_elems = (hid * in_n + hid + hid * hid + hid + out_n * hid + out_n)
    cost = pl.CostEstimate(
        flops=2 * B * (in_n * hid + 3 * hid * hid + hid * out_n),
        transcendentals=B * out_n,  # sigmoid
        bytes_accessed=4 * (B * (in_n + out_n) + weight_elems),
    )

    return pl.pallas_call(
        ann_tlc_kernel,
        out_shape=jax.ShapeDtypeStruct((B, out_n), jnp.float32),
        grid_spec=pltpu.PrefetchScalarGridSpec(
            num_scalar_prefetch=0,
            grid=grid,
            in_specs=[x_spec, w_in_spec, b_in_spec, w_h_spec, b_h_spec,
                      w_out_spec, b_out_spec],
            out_specs=o_spec,
        ),
        compiler_params=pltpu.CompilerParams(
            dimension_semantics=("parallel",)),
        cost_estimate=cost,
    )(x, params["w_in"], params["b_in"], params["w_h"], params["b_h"],
      params["w_out"], params["b_out"])


def init_params(key, in_neuron, hidden_neuron, out_neuron):
    """PyTorch nn.Linear-style init U(-1/sqrt(fan_in), 1/sqrt(fan_in)).
    Weights stored PyTorch-native (out_features, in_features); bias (out, 1)."""
    ks = jax.random.split(key, 6)

    def lin(kw, kb, fan_in, fan_out):
        bound = 1.0 / jnp.sqrt(jnp.float32(fan_in))
        w = jax.random.uniform(kw, (fan_out, fan_in), jnp.float32, -bound, bound)
        b = jax.random.uniform(kb, (fan_out, 1), jnp.float32, -bound, bound)
        return w, b

    w_in, b_in = lin(ks[0], ks[1], in_neuron, hidden_neuron)
    w_h, b_h = lin(ks[2], ks[3], hidden_neuron, hidden_neuron)
    w_out, b_out = lin(ks[4], ks[5], hidden_neuron, out_neuron)
    return dict(w_in=w_in, b_in=b_in, w_h=w_h, b_h=b_h,
                w_out=w_out, b_out=b_out)


def ann_tlc_reference(x, p):
    """Pure-JAX f32 reference (batch-major layout) for correctness."""
    h = _leaky_relu(x @ p["w_in"].T + p["b_in"].T)
    for _ in range(3):
        h = _leaky_relu(h @ p["w_h"].T + p["b_h"].T)
    return jax.nn.sigmoid(h @ p["w_out"].T + p["b_out"].T)


if __name__ == "__main__":
    key = jax.random.PRNGKey(0)
    k_x, k_x2, k_p = jax.random.split(key, 3)

    in_neuron, hidden_neuron, out_neuron = 16, 32, 4
    params = init_params(k_p, in_neuron, hidden_neuron, out_neuron)

    # Tolerance relaxed deliberately: MXU operands are bf16 (f32 accumulate).
    TOL = dict(atol=2e-2, rtol=2e-2)

    # Small single-(partial-)tile case.
    batch = 8
    x = jax.random.normal(k_x, (batch, in_neuron), jnp.float32)
    out = jax.block_until_ready(ann_tlc_forward(x, params))
    ref = jax.block_until_ready(ann_tlc_reference(x, params))
    assert out.shape == (batch, out_neuron)
    assert jnp.allclose(out, ref, **TOL), "mismatch vs reference (single tile)"

    # Multi-tile case exercising the batch pipeline + masked partial last block.
    batch2 = 300
    x2 = jax.random.normal(k_x2, (batch2, in_neuron), jnp.float32)
    ref2 = jax.block_until_ready(ann_tlc_reference(x2, params))

    out2 = jax.block_until_ready(ann_tlc_forward(x2, params, batch_tile=128))
    assert out2.shape == (batch2, out_neuron)
    assert jnp.allclose(out2, ref2, **TOL), "mismatch vs reference (multi tile)"

    # Default tile path: exercises the >=2-grid-step split for v7x megacore.
    out3 = jax.block_until_ready(ann_tlc_forward(x2, params))
    assert out3.shape == (batch2, out_neuron)
    assert jnp.allclose(out3, ref2, **TOL), "mismatch vs reference (megacore split)"

    print("KERNEL_OK")
</pallas_src>

<mosaic_0001>
module attributes {stable_mosaic.version = 11 : i64} {
  func.func @ann_tlc_kernel(%arg0: i32, %arg1: memref<128x16xf32, #tpu.memory_space<vmem>>, %arg2: memref<32x16xf32, #tpu.memory_space<vmem>>, %arg3: memref<32x1xf32, #tpu.memory_space<vmem>>, %arg4: memref<32x32xf32, #tpu.memory_space<vmem>>, %arg5: memref<32x1xf32, #tpu.memory_space<vmem>>, %arg6: memref<4x32xf32, #tpu.memory_space<vmem>>, %arg7: memref<4x1xf32, #tpu.memory_space<vmem>>, %arg8: memref<128x4xf32, #tpu.memory_space<vmem>>) attributes {dimension_semantics = [#tpu.dimension_semantics<parallel>], iteration_bounds = array<i64: 1>, scalar_prefetch = 0 : i64, scratch_operands = 0 : i64, tpu.core_type = #tpu.core_type<tc>, window_params = [{transform_indices = @transform_0, window_bounds = array<i64: 128, 16>}, {pipeline_mode = #tpu.pipeline_mode<synchronous>, transform_indices = @transform_1, window_bounds = array<i64: 32, 16>}, {pipeline_mode = #tpu.pipeline_mode<synchronous>, transform_indices = @transform_2, window_bounds = array<i64: 32, 1>}, {pipeline_mode = #tpu.pipeline_mode<synchronous>, transform_indices = @transform_3, window_bounds = array<i64: 32, 32>}, {pipeline_mode = #tpu.pipeline_mode<synchronous>, transform_indices = @transform_4, window_bounds = array<i64: 32, 1>}, {pipeline_mode = #tpu.pipeline_mode<synchronous>, transform_indices = @transform_5, window_bounds = array<i64: 4, 32>}, {pipeline_mode = #tpu.pipeline_mode<synchronous>, transform_indices = @transform_6, window_bounds = array<i64: 4, 1>}, {transform_indices = @transform_7, window_bounds = array<i64: 128, 4>}]} {
    %c0 = arith.constant 0 : index
    %c0_0 = arith.constant 0 : index
    %0 = vector.load %arg1[%c0, %c0_0] : memref<128x16xf32, #tpu.memory_space<vmem>>, vector<128x16xf32>
    %1 = tpu.transpose %0, [1, 0] : vector<128x16xf32> -> vector<16x128xf32>
    %2 = arith.truncf %1 : vector<16x128xf32> to vector<16x128xbf16>
    %c0_1 = arith.constant 0 : index
    %c0_2 = arith.constant 0 : index
    %3 = vector.load %arg2[%c0_1, %c0_2] : memref<32x16xf32, #tpu.memory_space<vmem>>, vector<32x16xf32>
    %4 = arith.truncf %3 : vector<32x16xf32> to vector<32x16xbf16>
    %cst = arith.constant dense<0.000000e+00> : vector<32x128xf32>
    %5 = tpu.matmul %4, %2, %cst {dimension_numbers = #tpu.dot_dimension_numbers<[1], [0], [0], [1], [0, 0, 1, 1], [], []>} : vector<32x16xbf16>, vector<16x128xbf16>, vector<32x128xf32> -> vector<32x128xf32>
    %c0_3 = arith.constant 0 : index
    %c0_4 = arith.constant 0 : index
    %6 = vector.load %arg3[%c0_3, %c0_4] : memref<32x1xf32, #tpu.memory_space<vmem>>, vector<32x1xf32>
    %7 = vector.broadcast %6 : vector<32x1xf32> to vector<32x128xf32>
    %8 = arith.addf %5, %7 : vector<32x128xf32>
    %cst_5 = arith.constant 0.000000e+00 : f32
    %9 = vector.broadcast %cst_5 : f32 to vector<32x128xf32>
    %10 = arith.cmpf oge, %8, %9 : vector<32x128xf32>
    %cst_6 = arith.constant 0.00999999977 : f32
    %11 = vector.broadcast %cst_6 : f32 to vector<32x128xf32>
    %12 = arith.mulf %11, %8 : vector<32x128xf32>
    %13 = arith.select %10, %8, %12 : vector<32x128xi1>, vector<32x128xf32>
    %c0_7 = arith.constant 0 : index
    %c0_8 = arith.constant 0 : index
    %14 = vector.load %arg4[%c0_7, %c0_8] : memref<32x32xf32, #tpu.memory_space<vmem>>, vector<32x32xf32>
    %15 = arith.truncf %14 : vector<32x32xf32> to vector<32x32xbf16>
    %c0_9 = arith.constant 0 : index
    %c0_10 = arith.constant 0 : index
    %16 = vector.load %arg5[%c0_9, %c0_10] : memref<32x1xf32, #tpu.memory_space<vmem>>, vector<32x1xf32>
    %17 = arith.truncf %13 : vector<32x128xf32> to vector<32x128xbf16>
    %cst_11 = arith.constant dense<0.000000e+00> : vector<32x128xf32>
    %18 = tpu.matmul %15, %17, %cst_11 {dimension_numbers = #tpu.dot_dimension_numbers<[1], [0], [0], [1], [0, 0, 1, 1], [], []>} : vector<32x32xbf16>, vector<32x128xbf16>, vector<32x128xf32> -> vector<32x128xf32>
    %19 = vector.broadcast %16 : vector<32x1xf32> to vector<32x128xf32>
    %20 = arith.addf %18, %19 : vector<32x128xf32>
    %cst_12 = arith.constant 0.000000e+00 : f32
    %21 = vector.broadcast %cst_12 : f32 to vector<32x128xf32>
    %22 = arith.cmpf oge, %20, %21 : vector<32x128xf32>
    %cst_13 = arith.constant 0.00999999977 : f32
    %23 = vector.broadcast %cst_13 : f32 to vector<32x128xf32>
    %24 = arith.mulf %23, %20 : vector<32x128xf32>
    %25 = arith.select %22, %20, %24 : vector<32x128xi1>, vector<32x128xf32>
    %26 = arith.truncf %25 : vector<32x128xf32> to vector<32x128xbf16>
    %cst_14 = arith.constant dense<0.000000e+00> : vector<32x128xf32>
    %27 = tpu.matmul %15, %26, %cst_14 {dimension_numbers = #tpu.dot_dimension_numbers<[1], [0], [0], [1], [0, 0, 1, 1], [], []>} : vector<32x32xbf16>, vector<32x128xbf16>, vector<32x128xf32> -> vector<32x128xf32>
    %28 = vector.broadcast %16 : vector<32x1xf32> to vector<32x128xf32>
    %29 = arith.addf %27, %28 : vector<32x128xf32>
    %cst_15 = arith.constant 0.000000e+00 : f32
    %30 = vector.broadcast %cst_15 : f32 to vector<32x128xf32>
    %31 = arith.cmpf oge, %29, %30 : vector<32x128xf32>
    %cst_16 = arith.constant 0.00999999977 : f32
    %32 = vector.broadcast %cst_16 : f32 to vector<32x128xf32>
    %33 = arith.mulf %32, %29 : vector<32x128xf32>
    %34 = arith.select %31, %29, %33 : vector<32x128xi1>, vector<32x128xf32>
    %35 = arith.truncf %34 : vector<32x128xf32> to vector<32x128xbf16>
    %cst_17 = arith.constant dense<0.000000e+00> : vector<32x128xf32>
    %36 = tpu.matmul %15, %35, %cst_17 {dimension_numbers = #tpu.dot_dimension_numbers<[1], [0], [0], [1], [0, 0, 1, 1], [], []>} : vector<32x32xbf16>, vector<32x128xbf16>, vector<32x128xf32> -> vector<32x128xf32>
    %37 = vector.broadcast %16 : vector<32x1xf32> to vector<32x128xf32>
    %38 = arith.addf %36, %37 : vector<32x128xf32>
    %cst_18 = arith.constant 0.000000e+00 : f32
    %39 = vector.broadcast %cst_18 : f32 to vector<32x128xf32>
    %40 = arith.cmpf oge, %38, %39 : vector<32x128xf32>
    %cst_19 = arith.constant 0.00999999977 : f32
    %41 = vector.broadcast %cst_19 : f32 to vector<32x128xf32>
    %42 = arith.mulf %41, %38 : vector<32x128xf32>
    %43 = arith.select %40, %38, %42 : vector<32x128xi1>, vector<32x128xf32>
    %c0_20 = arith.constant 0 : index
    %c0_21 = arith.constant 0 : index
    %44 = vector.load %arg6[%c0_20, %c0_21] : memref<4x32xf32, #tpu.memory_space<vmem>>, vector<4x32xf32>
    %45 = arith.truncf %44 : vector<4x32xf32> to vector<4x32xbf16>
    %46 = arith.truncf %43 : vector<32x128xf32> to vector<32x128xbf16>
    %cst_22 = arith.constant dense<0.000000e+00> : vector<4x128xf32>
    %47 = tpu.matmul %45, %46, %cst_22 {dimension_numbers = #tpu.dot_dimension_numbers<[1], [0], [0], [1], [0, 0, 1, 1], [], []>} : vector<4x32xbf16>, vector<32x128xbf16>, vector<4x128xf32> -> vector<4x128xf32>
    %c0_23 = arith.constant 0 : index
    %c0_24 = arith.constant 0 : index
    %48 = vector.load %arg7[%c0_23, %c0_24] : memref<4x1xf32, #tpu.memory_space<vmem>>, vector<4x1xf32>
    %49 = vector.broadcast %48 : vector<4x1xf32> to vector<4x128xf32>
    %50 = arith.addf %47, %49 : vector<4x128xf32>
    %51 = arith.negf %50 : vector<4x128xf32>
    %52 = math.exp %51 : vector<4x128xf32>
    %cst_25 = arith.constant 1.000000e+00 : f32
    %53 = vector.broadcast %cst_25 : f32 to vector<4x128xf32>
    %54 = arith.addf %53, %52 : vector<4x128xf32>
    %55 = arith.divf %53, %54 : vector<4x128xf32>
    %56 = tpu.transpose %55, [1, 0] : vector<4x128xf32> -> vector<128x4xf32>
    %c0_26 = arith.constant 0 : index
    %c0_27 = arith.constant 0 : index
    %57 = vector.load %arg8[%c0_26, %c0_27] : memref<128x4xf32, #tpu.memory_space<vmem>>, vector<128x4xf32>
    tpu.vector_store %arg8[%c0_26, %c0_27], %56 {strides = array<i32>} : memref<128x4xf32, #tpu.memory_space<vmem>>, vector<128x4xf32>,
    return
  }
  func.func @transform_0(%arg0: i32) -> (i32, i32) {
    %c0_i32 = arith.constant 0 : i32
    %c0_i32_0 = arith.constant 0 : i32
    return %arg0, %c0_i32 : i32, i32
  }
  func.func @transform_1(%arg0: i32) -> (i32, i32) {
    %c0_i32 = arith.constant 0 : i32
    %c0_i32_0 = arith.constant 0 : i32
    %c0_i32_1 = arith.constant 0 : i32
    return %c0_i32, %c0_i32_0 : i32, i32
  }
  func.func @transform_2(%arg0: i32) -> (i32, i32) {
    %c0_i32 = arith.constant 0 : i32
    %c0_i32_0 = arith.constant 0 : i32
    %c0_i32_1 = arith.constant 0 : i32
    return %c0_i32, %c0_i32_0 : i32, i32
  }
  func.func @transform_3(%arg0: i32) -> (i32, i32) {
    %c0_i32 = arith.constant 0 : i32
    %c0_i32_0 = arith.constant 0 : i32
    %c0_i32_1 = arith.constant 0 : i32
    return %c0_i32, %c0_i32_0 : i32, i32
  }
  func.func @transform_4(%arg0: i32) -> (i32, i32) {
    %c0_i32 = arith.constant 0 : i32
    %c0_i32_0 = arith.constant 0 : i32
    %c0_i32_1 = arith.constant 0 : i32
    return %c0_i32, %c0_i32_0 : i32, i32
  }
  func.func @transform_5(%arg0: i32) -> (i32, i32) {
    %c0_i32 = arith.constant 0 : i32
    %c0_i32_0 = arith.constant 0 : i32
    %c0_i32_1 = arith.constant 0 : i32
    return %c0_i32, %c0_i32_0 : i32, i32
  }
  func.func @transform_6(%arg0: i32) -> (i32, i32) {
    %c0_i32 = arith.constant 0 : i32
    %c0_i32_0 = arith.constant 0 : i32
    %c0_i32_1 = arith.constant 0 : i32
    return %c0_i32, %c0_i32_0 : i32, i32
  }
  func.func @transform_7(%arg0: i32) -> (i32, i32) {
    %c0_i32 = arith.constant 0 : i32
    %c0_i32_0 = arith.constant 0 : i32
    return %arg0, %c0_i32 : i32, i32
  }
}

</mosaic_0001>

<bundles_post_ra>
// kernel: tpu_custom_call.1
= control target key start
LH: loop header
LB: loop body
LE: loop exit
PB: predicated region body
PF: predicated region fallthrough
CT: control target
= control target key end

     0   :  { %v434_v16 = vmov 0   ;;  %vm106_vm0 = vcmask 130048   ;;  %vm176_vm5 = vcmask 261120   ;;  %s587_s0 = inlined_call_operand.vmem [shape: f32[8,16], index: 0, kind: input, shape index: {}]   ;;  %s588_s1 = inlined_call_operand.vmem [shape: f32[32,16], index: 1, kind: input, shape index: {}]   ;;  %s589_s2 = inlined_call_operand.vmem [shape: f32[32,1], index: 2, kind: input, shape index: {}]   ;;  %s590_s3 = inlined_call_operand.vmem [shape: f32[32,32], index: 3, kind: input, shape index: {}]   ;;  %s591_s4 = inlined_call_operand.vmem [shape: f32[32,1], index: 4, kind: input, shape index: {}]   ;;  %s592_s5 = inlined_call_operand.vmem [shape: f32[4,32], index: 5, kind: input, shape index: {}]   ;;  %s593_s6 = inlined_call_operand.vmem [shape: f32[4,1], index: 6, kind: input, shape index: {}]   ;;  %s594_s7 = inlined_call_operand.vmem [shape: f32[8,4], index: 7, kind: output, shape index: {}]  }
   0x1   :  { %v27_v0 = vld [vmem:[%s587_s0] sm:$0xff]  ;;  %v28_v1 = vld [vmem:[%s587_s0 + $0x8] sm:$0xff]  ;;  %v29_v2 = vld [vmem:[%s587_s0 + $0x10] sm:$0xff]  ;;  %427 = vset.pattern.permute.xlu1 %v434_v16  ;;  %428 = vset.pattern.permute.xlu2 %v434_v16 }
   0x2   :  { %43 = vxpose.xlu0.b32.start [1/16] (narrow) %v27_v0, 16  ;;  %v30_v3 = vld [vmem:[%s587_s0 + $0x18] sm:$0xff]  ;;  %v31_v4 = vld [vmem:[%s587_s0 + $0x20] sm:$0xff]  ;;  %v32_v5 = vld [vmem:[%s587_s0 + $0x28] sm:$0xff] }
   0x3   :  { %v33_v6 = vld [vmem:[%s587_s0 + $0x30] sm:$0xff]  ;;  %v34_v7 = vld [vmem:[%s587_s0 + $0x38] sm:$0xff]  ;;  %v35_v8 = vld [vmem:[%s587_s0 + $0x40] sm:$0xff] }
   0x4   :  { %v36_v9 = vld [vmem:[%s587_s0 + $0x48] sm:$0xff]  ;;  %v37_v10 = vld [vmem:[%s587_s0 + $0x50] sm:$0xff]  ;;  %v38_v11 = vld [vmem:[%s587_s0 + $0x58] sm:$0xff] }
   0x5   :  { %v39_v12 = vld [vmem:[%s587_s0 + $0x60] sm:$0xff]  ;;  %v40_v13 = vld [vmem:[%s587_s0 + $0x68] sm:$0xff]  ;;  %v41_v14 = vld [vmem:[%s587_s0 + $0x70] sm:$0xff] }
   0x6   :  { %v42_v15 = vld [vmem:[%s587_s0 + $0x78] sm:$0xff]  ;;  %v84_v17 = vld [vmem:[%s589_s2 + $0x10] sm:$0xff]  ;;  %v150_v20 = vld [vmem:[%s591_s4] sm:$0xff] }
   0x7   :  { %98 = vperm.xlu1 %427, %v84_v17   ;;  %v85_v18 = vld [vmem:[%s589_s2 + $0x18] sm:$0xff]  ;;  %v152_v19 = vld [vmem:[%s591_s4 + $0x10] sm:$0xff]  ;;  %v82_v21 = vld [vmem:[%s589_s2] sm:$0xff] }
   0x8   :  { %88 = vperm.xlu2 %428, %v82_v21   ;;  %v83_v23 = vld [vmem:[%s589_s2 + $0x8] sm:$0xff]  ;;  %v284_v24 = vld [vmem:[%s593_s6] sm:$0xf]  ;;  %v153_v30 = vld [vmem:[%s591_s4 + $0x18] sm:$0xff] }
   0x9   :  { %v76_v25 = vld [vmem:[%s588_s1] sm:$0xff]  ;;  %v77_v26 = vld [vmem:[%s588_s1 + $0x8] sm:$0xff]  ;;  %v78_v32 = vld [vmem:[%s588_s1 + $0x10] sm:$0xff] }
   0xa   :  { %44 = vxpose.xlu0.b32.cont [2/16] (narrow) %v28_v1, 16  ;;  %v80_v29 = vpack.c.bf16 %v77_v26, %v76_v25  ;;  %v151_v31 = vld [vmem:[%s591_s4 + $0x8] sm:$0xff]  ;;  %v79_v33 = vld [vmem:[%s588_s1 + $0x18] sm:$0xff]  ;;  %v144_v55 = vld [vmem:[%s590_s3] sm:$0xff] }
   0xb   :  { %v81_v34 = vpack.c.bf16 %v79_v33, %v78_v32  ;;  %v145_v56 = vld [vmem:[%s590_s3 + $0x8] sm:$0xff]  ;;  %v146_v60 = vld [vmem:[%s590_s3 + $0x10] sm:$0xff]  ;;  %v147_v61 = vld [vmem:[%s590_s3 + $0x18] sm:$0xff] }
   0xc   :  { %v148_v59 = vpack.c.bf16 %v145_v56, %v144_v55  ;;  %v149_v62 = vpack.c.bf16 %v147_v61, %v146_v60  ;;  %v280_v55 = vld [vmem:[%s592_s5] sm:$0xf] }
   0xf   :  { %103 = vperm.xlu1 %427, %v85_v18  }
  0x10   :  { %93 = vperm.xlu2 %428, %v83_v23  }
  0x12   :  { %45 = vxpose.xlu0.b32.cont [3/16] (narrow) %v29_v2, 16 }
  0x17   :  { %168 = vperm.xlu1 %427, %v152_v19  }
  0x18   :  { %173 = vperm.xlu2 %428, %v153_v30  }
  0x1a   :  { %46 = vxpose.xlu0.b32.cont [4/16] (narrow) %v30_v3, 16 }
  0x1f   :  { %158 = vperm.xlu1 %427, %v150_v20  }
  0x20   :  { %163 = vperm.xlu2 %428, %v151_v31  }
  0x22   :  { %47 = vxpose.xlu0.b32.cont [5/16] (narrow) %v31_v4, 16 }
  0x27   :  { %287 = vperm.xlu1 %427, %v284_v24  }
  0x2a   :  { %48 = vxpose.xlu0.b32.cont [6/16] (narrow) %v32_v5, 16 }
  0x32   :  { %49 = vxpose.xlu0.b32.cont [7/16] (narrow) %v33_v6, 16 }
  0x3a   :  { %50 = vxpose.xlu0.b32.cont [8/16] (narrow) %v34_v7, 16 }
  0x42   :  { %51 = vxpose.xlu0.b32.cont [9/16] (narrow) %v35_v8, 16 }
  0x4a   :  { %52 = vxpose.xlu0.b32.cont [10/16] (narrow) %v36_v9, 16 }
  0x52   :  { %53 = vxpose.xlu0.b32.cont [11/16] (narrow) %v37_v10, 16 }
  0x5a   :  { %54 = vxpose.xlu0.b32.cont [12/16] (narrow) %v38_v11, 16 }
  0x62   :  { %55 = vxpose.xlu0.b32.cont [13/16] (narrow) %v39_v12, 16  ;;  %v89_v37 = vpop.permute.xlu2 %88 }
  0x6a   :  { %56 = vxpose.xlu0.b32.cont [14/16] (narrow) %v40_v13, 16  ;;  %v94_v41 = vpop.permute.xlu2 %93 }
  0x72   :  { %57 = vxpose.xlu0.b32.cont [15/16] (narrow) %v41_v14, 16  ;;  %v174_v1 = vpop.permute.xlu2 %173 }
  0x79   :  { %v99_v38 = vpop.permute.xlu1 %98 }
  0x7a   :  { %58 = vxpose.xlu0.b32.end [16/16] (narrow) %v42_v15, 16  ;;  %v164_v5 = vpop.permute.xlu2 %163 }
  0x81   :  { %v104_v43 = vpop.permute.xlu1 %103 }
  0x89   :  { %v169_v2 = vpop.permute.xlu1 %168 }
  0x91   :  { %v159_v7 = vpop.permute.xlu1 %158 }
  0xa6   :  { %v59_v22 = vpop.trf.xlu0 }
  0xae   :  { %v60_v27 = vpop.trf.xlu0 }
  0xaf   :  { %v75_v28 = vpack.c.bf16 %v60_v27, %v59_v22 }
  0xb1   :  { %120 = vmatpush.bf16.msra.mxu0 %v75_v28 }
  0xb4   :  { %415 = vmatmul.msk.bf16.vlgmr.msra.gmra.mxu0 %vm106_vm0, %v80_v29 }
  0xc4   :  { %416 = vmatmul.msk.bf16.gmra.mxu0 %vm106_vm0, %v81_v34 }
  0xe1   :  { %429 = vset.pattern.permute.xlu0 %v434_v16 }
 0x131   :  { %v122_v35 = vpop.f32.mrf.mxu0 }
 0x132   :  { %v123_v45 = vadd.f32 %v122_v35, %v89_v37 }
 0x134   :  { %v136_v50 = vmul.f32 0.01, %v123_v45  ;;  %vm132_vm4 = vcmp.ge.f32.partialorder %v123_v45, 0.0 }
 0x136   :  { %v140_v57 = vsel %vm132_vm4, %v123_v45, %v136_v50 }
 0x139   :  { %v124_v36 = vpop.f32.mrf.mxu0 }
 0x13a   :  { %v125_v42 = vadd.f32 %v124_v36, %v94_v41 }
 0x13c   :  { %v137_v48 = vmul.f32 0.01, %v125_v42  ;;  %vm133_vm3 = vcmp.ge.f32.partialorder %v125_v42, 0.0 }
 0x13e   :  { %v141_v54 = vsel %vm133_vm3, %v125_v42, %v137_v48 }
 0x13f   :  { %v154_v58 = vpack.c.bf16 %v141_v54, %v140_v57 }
 0x141   :  { %v127_v39 = vpop.f32.mrf.mxu0 }
 0x142   :  { %v128_v40 = vadd.f32 %v127_v39, %v99_v38 }
 0x144   :  { %v138_v46 = vmul.f32 0.01, %v128_v40  ;;  %vm134_vm1 = vcmp.ge.f32.partialorder %v128_v40, 0.0 }
 0x146   :  { %v142_v51 = vsel %vm134_vm1, %v128_v40, %v138_v46 }
 0x149   :  { %v129_v44 = vpop.f32.mrf.mxu0 }
 0x14a   :  { %v130_v47 = vadd.f32 %v129_v44, %v104_v43 }
 0x14c   :  { %v139_v49 = vmul.f32 0.01, %v130_v47  ;;  %vm135_vm2 = vcmp.ge.f32.partialorder %v130_v47, 0.0 }
 0x14e   :  { %v143_v52 = vsel %vm135_vm2, %v130_v47, %v139_v49 }
 0x14f   :  { %v155_v53 = vpack.c.bf16 %v143_v52, %v142_v51 }
 0x151   :  { %189 = vmatpush.bf16.msra.mxu1 %v155_v53 }
 0x155   :  { %190 = vmatpush.bf16.msra.mxu1 %v154_v58  ;;  %v281_v58 = vpack.c.bf16 %v280_v55, %v280_v55 }
 0x158   :  { %417 = vmatmul.msk.bf16.vlgmr.msra.gmra.mxu1 %vm176_vm5, %v148_v59 }
 0x168   :  { %418 = vmatmul.msk.bf16.gmra.mxu1 %vm176_vm5, %v149_v62 }
 0x1d5   :  { %v192_v63 = vpop.f32.mrf.mxu1 }
 0x1d6   :  { %v193_v9 = vadd.f32 %v192_v63, %v159_v7 }
 0x1d8   :  { %v206_v14 = vmul.f32 0.01, %v193_v9  ;;  %vm202_vm9 = vcmp.ge.f32.partialorder %v193_v9, 0.0 }
 0x1da   :  { %v210_v19 = vsel %vm202_vm9, %v193_v9, %v206_v14 }
 0x1dd   :  { %v194_v0 = vpop.f32.mrf.mxu1 }
 0x1de   :  { %v195_v6 = vadd.f32 %v194_v0, %v164_v5 }
 0x1e0   :  { %v207_v12 = vmul.f32 0.01, %v195_v6  ;;  %vm203_vm8 = vcmp.ge.f32.partialorder %v195_v6, 0.0 }
 0x1e2   :  { %v211_v18 = vsel %vm203_vm8, %v195_v6, %v207_v12 }
 0x1e3   :  { %v214_v20 = vpack.c.bf16 %v211_v18, %v210_v19 }
 0x1e5   :  { %v197_v3 = vpop.f32.mrf.mxu1 }
 0x1e6   :  { %v198_v4 = vadd.f32 %v197_v3, %v169_v2 }
 0x1e8   :  { %v208_v10 = vmul.f32 0.01, %v198_v4  ;;  %vm204_vm6 = vcmp.ge.f32.partialorder %v198_v4, 0.0 }
 0x1ea   :  { %v212_v15 = vsel %vm204_vm6, %v198_v4, %v208_v10  ;;  %vm357_vm6 = vcmask 31744  }
 0x1ed   :  { %v199_v8 = vpop.f32.mrf.mxu1 }
 0x1ee   :  { %v200_v11 = vadd.f32 %v199_v8, %v174_v1 }
 0x1f0   :  { %v209_v13 = vmul.f32 0.01, %v200_v11  ;;  %vm205_vm7 = vcmp.ge.f32.partialorder %v200_v11, 0.0 }
 0x1f2   :  { %v213_v16 = vsel %vm205_vm7, %v200_v11, %v209_v13 }
 0x1f3   :  { %v215_v17 = vpack.c.bf16 %v213_v16, %v212_v15 }
 0x1f5   :  { %222 = vmatpush.bf16.msra.mxu2 %v215_v17 }
 0x1f9   :  { %223 = vmatpush.bf16.msra.mxu2 %v214_v20 }
 0x1fc   :  { %419 = vmatmul.msk.bf16.vlgmr.msra.gmra.mxu2 %vm176_vm5, %v148_v59 }
 0x20c   :  { %420 = vmatmul.msk.bf16.gmra.mxu2 %vm176_vm5, %v149_v62 }
 0x27f   :  { %v225_v21 = vpop.f32.mrf.mxu2 }
 0x280   :  { %v226_v27 = vadd.f32 %v225_v21, %v159_v7 }
 0x282   :  { %v239_v32 = vmul.f32 0.01, %v226_v27  ;;  %vm235_vm13 = vcmp.ge.f32.partialorder %v226_v27, 0.0 }
 0x284   :  { %v243_v37 = vsel %vm235_vm13, %v226_v27, %v239_v32 }
 0x287   :  { %v227_v22 = vpop.f32.mrf.mxu2 }
 0x288   :  { %v228_v25 = vadd.f32 %v227_v22, %v164_v5 }
 0x28a   :  { %v240_v30 = vmul.f32 0.01, %v228_v25  ;;  %vm236_vm12 = vcmp.ge.f32.partialorder %v228_v25, 0.0 }
 0x28c   :  { %v244_v36 = vsel %vm236_vm12, %v228_v25, %v240_v30 }
 0x28d   :  { %v247_v38 = vpack.c.bf16 %v244_v36, %v243_v37 }
 0x28f   :  { %v230_v23 = vpop.f32.mrf.mxu2 }
 0x290   :  { %v231_v24 = vadd.f32 %v230_v23, %v169_v2 }
 0x292   :  { %v241_v28 = vmul.f32 0.01, %v231_v24  ;;  %vm237_vm10 = vcmp.ge.f32.partialorder %v231_v24, 0.0 }
 0x294   :  { %v245_v33 = vsel %vm237_vm10, %v231_v24, %v241_v28 }
 0x297   :  { %v232_v26 = vpop.f32.mrf.mxu2 }
 0x298   :  { %v233_v29 = vadd.f32 %v232_v26, %v174_v1 }
 0x29a   :  { %v242_v31 = vmul.f32 0.01, %v233_v29  ;;  %vm238_vm11 = vcmp.ge.f32.partialorder %v233_v29, 0.0 }
 0x29c   :  { %v246_v34 = vsel %vm238_vm11, %v233_v29, %v242_v31 }
 0x29d   :  { %v248_v35 = vpack.c.bf16 %v246_v34, %v245_v33 }
 0x29f   :  { %255 = vmatpush.bf16.msra.mxu3 %v248_v35 }
 0x2a3   :  { %256 = vmatpush.bf16.msra.mxu3 %v247_v38 }
 0x2a6   :  { %421 = vmatmul.msk.bf16.vlgmr.msra.gmra.mxu3 %vm176_vm5, %v148_v59  ;;  %v288_v59 = vpop.permute.xlu1 %287 }
 0x2b6   :  { %422 = vmatmul.msk.bf16.gmra.mxu3 %vm176_vm5, %v149_v62 }
 0x329   :  { %v258_v39 = vpop.f32.mrf.mxu3 }
 0x32a   :  { %v259_v45 = vadd.f32 %v258_v39, %v159_v7 }
 0x32c   :  { %v272_v50 = vmul.f32 0.01, %v259_v45  ;;  %vm268_vm1 = vcmp.ge.f32.partialorder %v259_v45, 0.0 }
 0x32e   :  { %v276_v56 = vsel %vm268_vm1, %v259_v45, %v272_v50 }
 0x331   :  { %v260_v40 = vpop.f32.mrf.mxu3 }
 0x332   :  { %v261_v43 = vadd.f32 %v260_v40, %v164_v5 }
 0x334   :  { %v273_v48 = vmul.f32 0.01, %v261_v43  ;;  %vm269_vm0 = vcmp.ge.f32.partialorder %v261_v43, 0.0 }
 0x336   :  { %v277_v54 = vsel %vm269_vm0, %v261_v43, %v273_v48 }
 0x337   :  { %v282_v57 = vpack.c.bf16 %v277_v54, %v276_v56 }
 0x339   :  { %v263_v41 = vpop.f32.mrf.mxu3 }
 0x33a   :  { %v264_v42 = vadd.f32 %v263_v41, %v169_v2 }
 0x33c   :  { %v274_v46 = vmul.f32 0.01, %v264_v42  ;;  %vm270_vm14 = vcmp.ge.f32.partialorder %v264_v42, 0.0 }
 0x33e   :  { %v278_v51 = vsel %vm270_vm14, %v264_v42, %v274_v46 }
 0x341   :  { %v265_v44 = vpop.f32.mrf.mxu3 }
 0x342   :  { %v266_v47 = vadd.f32 %v265_v44, %v174_v1 }
 0x344   :  { %v275_v49 = vmul.f32 0.01, %v266_v47  ;;  %vm271_vm15 = vcmp.ge.f32.partialorder %v266_v47, 0.0 }
 0x346   :  { %v279_v52 = vsel %vm271_vm15, %v266_v47, %v275_v49 }
 0x347   :  { %v283_v53 = vpack.c.bf16 %v279_v52, %v278_v51 }
 0x349   :  { %299 = vmatpush.bf16.msrb.mxu0 %v283_v53 }
 0x34d   :  { %300 = vmatpush.bf16.msrb.mxu0 %v282_v57 }
 0x350   :  { %423 = vmatmul.msk.bf16.vlgmr.msrb.gmra.mxu0 %vm176_vm5, %v281_v58 }
 0x3cd   :  { %v302_v60 = vpop.f32.mrf.mxu0 }
 0x3ce   :  { %v303_v61 = vadd.f32 %v302_v60, %v288_v59 }
 0x3d0   :  { %v424_v62 = vmul.f32 -1.442695, %v303_v61 }
 0x3d2   :  { %430 = vpow2.f32 %v424_v62 }
 0x3d5   :  { %v304_v63 = vpop.f32.mrf.mxu0 }
 0x3d8   :  { %v431_v0 = vpop.eup %430 }
 0x3d9   :  { %v309_v1 = vadd.f32 1.0, %v431_v0 }
 0x3db   :  { %432 = vrcp.f32 %v309_v1  ;;  %v321_v5 = vand.u32 2147483648, %v309_v1  ;;  %v319_v7 = vand.u32 2147483647, %v309_v1  ;;  %vm315_vm3 = vweird.f32 %v309_v1 }
 0x3dd   :  { %v322_v9 = vor.u32 1.1754944e-38, %v321_v5  ;;  %vm320_vm5 = vcmp.eq.f32.partialorder %v319_v7, 8.507059e+37 }
 0x3e1   :  { %v433_v2 = vpop.eup %432 }
 0x3e2   :  { %v311_v3 = vmul.f32 %v433_v2, %v309_v1  ;;  %vm316_vm2 = vweird.f32 %v433_v2 }
 0x3e3   :  { %vm317_vm4 = vmor %vm315_vm3, %vm316_vm2 }
 0x3e4   :  { %v312_v4 = vsub.f32 1.0, %v311_v3 }
 0x3e6   :  { %v313_v6 = vmul.f32 %v433_v2, %v312_v4 }
 0x3e8   :  { %v314_v8 = vadd.f32 %v433_v2, %v313_v6 }
 0x3ea   :  { %v318_v10 = vsel %vm317_vm4, %v433_v2, %v314_v8 }
 0x3eb   :  { %v323_v11 = vsel %vm320_vm5, %v322_v9, %v318_v10 }
 0x3ec   :  { %325 = vxpose.xlu2.b32.start.end [1/1] (short) %v323_v11, 128 }
 0x485   :  { %v341_v12 = vpop.trf.xlu2 }
 0x486   :  { %358 = vst.msk [vmem:[#allocation2] sm:$0xff] %vm357_vm6, %v341_v12 }
 0x48d   :  { %v404_v13 = vld [vmem:[#allocation2] sm:$0xff]  ;;  %v342_v14 = vpop.trf.xlu2 }
 0x48e   :  { %405 = vst [vmem:[%s594_s7] sm:$0xff] %v404_v13 }
 0x495   :  { %v343_v15 = vpop.trf.xlu2 }
 0x49d   :  { %v344_v16 = vpop.trf.xlu2 }
 0x4a5   :  { %v345_v17 = vpop.trf.xlu2 }
 0x4ad   :  { %v346_v18 = vpop.trf.xlu2 }
 0x4b5   :  { %v347_v19 = vpop.trf.xlu2 }
 0x4bd   :  { %v348_v20 = vpop.trf.xlu2 }
 0x4c5   :  { %v349_v21 = vpop.trf.xlu2 }
 0x4cd   :  { %v350_v22 = vpop.trf.xlu2 }
 0x4d5   :  { %v351_v23 = vpop.trf.xlu2 }
 0x4dd   :  { %v352_v24 = vpop.trf.xlu2 }
 0x4e5   :  { %v353_v25 = vpop.trf.xlu2 }
 0x4ed   :  { %v354_v26 = vpop.trf.xlu2 }
 0x4f5   :  { %v355_v27 = vpop.trf.xlu2 }
 0x4fd   :  { %v356_v28 = vpop.trf.xlu2 }

</bundles_post_ra>
